<compile_context>
chip_gen: v7x
topology: tpu7x:2x2x1
jax: 0.10.0
libtpu: 0.0.40
codegen_flags: <defaults>
</compile_context>

<pallas_src>
import functools

import jax
import jax.numpy as jnp
from jax.experimental import pallas as pl
from jax.experimental.pallas import tpu as pltpu


def _conv3x3(x, w_ref, mask_ref, xpad_ref, *, cin, cout, h, w, p):
    """3x3 / stride-1 / pad-1 convolution of one image.

    x        : [cin, h*w]        value (channel-major, flat spatial on lanes)
    w_ref    : [9, cout, cin]    tap-major repacked weights
    mask_ref : [2, h*w]          row 0: (col != 0), row 1: (col != w-1)
    xpad_ref : [cin, h*w + 2*p]  VMEM scratch (zero halo of p lanes each side)
    returns  : [cout, h*w]       f32 conv output
    """
    hw = h * w

    # Rebuild zero halo + interior every grid step (safe under megacore
    # sharding; interior store starts at a 128-aligned lane offset).
    xpad_ref[:, 0:p] = jnp.zeros((cin, p), jnp.float32)
    xpad_ref[:, p:p + hw] = x
    xpad_ref[:, p + hw:p + hw + p] = jnp.zeros((cin, p), jnp.float32)
    xp = xpad_ref[...]

    mask_l = mask_ref[0:1, :]    # kills column 0      for dx == -1 taps
    mask_r = mask_ref[1:2, :]    # kills column w - 1  for dx == +1 taps

    acc = jnp.zeros((cout, hw), jnp.float32)
    for ky in range(3):
        dy = ky - 1
        for kx in range(3):
            dx = kx - 1
            off = p + dy * w + dx               # static lane offset
            tap = xp[:, off:off + hw]           # [cin, hw] shifted window
            if dx == -1:
                tap = tap * mask_l
            elif dx == 1:
                tap = tap * mask_r
            acc = acc + jnp.dot(w_ref[ky * 3 + kx], tap,
                                preferred_element_type=jnp.float32)
    return acc


def _stats_kernel(x_ref, w_ref, mask_ref, s_ref, xpad_ref, *, cin, cout, h, w, p):
    # s_ref: [1, cout, 2] -- col 0: sum(y), col 1: sum((y - image_mean)^2)
    hw = h * w
    y = _conv3x3(x_ref[0], w_ref, mask_ref, xpad_ref,
                 cin=cin, cout=cout, h=h, w=w, p=p)           # [cout, hw]
    s = jnp.sum(y, axis=1, keepdims=True)                     # [cout, 1]
    mu = s * (1.0 / hw)
    q = jnp.sum((y - mu) * (y - mu), axis=1, keepdims=True)   # [cout, 1]
    s_ref[0] = jnp.concatenate([s, q], axis=1)                # [cout, 2]


def _conv_bn_relu_kernel(x_ref, w_ref, mask_ref, st_ref, o_ref, xpad_ref, *,
                         cin, cout, h, w, p):
    # st_ref: [cout, 2] -- col 0: mean, col 1: 1/sqrt(var + eps)
    y = _conv3x3(x_ref[0], w_ref, mask_ref, xpad_ref,
                 cin=cin, cout=cout, h=h, w=w, p=p)           # [cout, hw]
    mean = st_ref[:, 0:1]
    inv_std = st_ref[:, 1:2]
    o_ref[0] = jnp.maximum((y - mean) * inv_std, 0.0)


def basic_layer(x_nchw, weight_oihw, eps=1e-5):
    """x_nchw: [N, Cin, H, W], weight_oihw: [Cout, Cin, 3, 3] -> [N, Cout, H, W]."""
    n, cin, h, w = x_nchw.shape
    cout = weight_oihw.shape[0]
    hw = h * w
    m = n * hw
    p = pl.cdiv(w + 1, 128) * 128          # halo lanes (>= w+1, 128-aligned)

    # Free layout glue: NCHW -> [N, Cin, H*W] is a contiguous reshape (no HBM
    # copy); only the tiny weight is repacked once.
    x_flat = x_nchw.reshape(n, cin, hw).astype(jnp.float32)
    w_taps = jnp.transpose(weight_oihw.astype(jnp.float32),
                           (2, 3, 0, 1)).reshape(9, cout, cin)

    col = jnp.arange(hw, dtype=jnp.int32) % w
    colmask = jnp.stack([col != 0, col != w - 1], axis=0).astype(jnp.float32)

    statics = dict(cin=cin, cout=cout, h=h, w=w, p=p)
    scratch = [pltpu.VMEM((cin, hw + 2 * p), jnp.float32)]
    cparams = pltpu.CompilerParams(dimension_semantics=("parallel",))

    # Pass 1: conv + per-image BN partials only (no conv intermediate in HBM).
    s_part = pl.pallas_call(
        functools.partial(_stats_kernel, **statics),
        grid=(n,),
        in_specs=[
            pl.BlockSpec((1, cin, hw), lambda i: (i, 0, 0)),
            pl.BlockSpec((9, cout, cin), lambda i: (0, 0, 0)),
            pl.BlockSpec((2, hw), lambda i: (0, 0)),
        ],
        out_specs=pl.BlockSpec((1, cout, 2), lambda i: (i, 0, 0)),
        out_shape=jax.ShapeDtypeStruct((n, cout, 2), jnp.float32),
        scratch_shapes=scratch,
        compiler_params=cparams,
    )(x_flat, w_taps, colmask)

    # Tiny cross-image combine (Chan's parallel variance; biased -> matches
    # training-mode BatchNorm normalization).
    s_sum = jnp.sum(s_part[:, :, 0], axis=0)                  # [cout]
    q_sum = jnp.sum(s_part[:, :, 1], axis=0)                  # [cout]
    mean = s_sum / m
    mean_img = s_part[:, :, 0] / hw                           # [n, cout]
    var = (q_sum + hw * jnp.sum((mean_img - mean[None, :]) ** 2, axis=0)) / m
    inv_std = jax.lax.rsqrt(jnp.maximum(var, 0.0) + eps)
    stats = jnp.stack([mean, inv_std], axis=1)                # [cout, 2]

    # Pass 2: recompute conv fused with BN + ReLU; output written directly in an
    # NCHW-reshapeable, unpadded layout (no wrapper slice / transpose).
    out_flat = pl.pallas_call(
        functools.partial(_conv_bn_relu_kernel, **statics),
        grid=(n,),
        in_specs=[
            pl.BlockSpec((1, cin, hw), lambda i: (i, 0, 0)),
            pl.BlockSpec((9, cout, cin), lambda i: (0, 0, 0)),
            pl.BlockSpec((2, hw), lambda i: (0, 0)),
            pl.BlockSpec((cout, 2), lambda i: (0, 0)),
        ],
        out_specs=pl.BlockSpec((1, cout, hw), lambda i: (i, 0, 0)),
        out_shape=jax.ShapeDtypeStruct((n, cout, hw), jnp.float32),
        scratch_shapes=scratch,
        compiler_params=cparams,
    )(x_flat, w_taps, colmask, stats)

    return out_flat.reshape(n, cout, h, w)


def _reference(x_nchw, weight_oihw, eps=1e-5):
    """Pure-JAX reference: conv -> batch-stat BN (affine=False) -> ReLU."""
    y = jax.lax.conv_general_dilated(
        x_nchw, weight_oihw, window_strides=(1, 1), padding=((1, 1), (1, 1)),
        dimension_numbers=("NCHW", "OIHW", "NCHW"))
    mean = jnp.mean(y, axis=(0, 2, 3), keepdims=True)
    var = jnp.mean((y - mean) ** 2, axis=(0, 2, 3), keepdims=True)
    return jnp.maximum((y - mean) * jax.lax.rsqrt(var + eps), 0.0)


if __name__ == "__main__":
    # Small shapes consistent with the module: N=2, Cin=4, Cout=8, H=W=16.
    key = jax.random.PRNGKey(0)
    kx, kw = jax.random.split(key)
    n, cin, cout, h, w = 2, 4, 8, 16, 16

    x = jax.random.normal(kx, (n, cin, h, w), dtype=jnp.float32)
    weight = 0.1 * jax.random.normal(kw, (cout, cin, 3, 3), dtype=jnp.float32)

    out = jax.block_until_ready(basic_layer(x, weight))

    ref = _reference(x, weight)
    assert out.shape == (n, cout, h, w)
    assert jnp.allclose(out, ref, atol=1e-4, rtol=1e-4), "mismatch vs reference"

    print("KERNEL_OK")
</pallas_src>

<mosaic_0001>
module attributes {stable_mosaic.version = 11 : i64} {
  func.func @_stats_kernel(%arg0: i32, %arg1: memref<1x4x256xf32, #tpu.memory_space<vmem>>, %arg2: memref<9x8x4xf32, #tpu.memory_space<vmem>>, %arg3: memref<2x256xf32, #tpu.memory_space<vmem>>, %arg4: memref<1x8x2xf32, #tpu.memory_space<vmem>>, %arg5: memref<4x512xf32, #tpu.memory_space<vmem>>) attributes {dimension_semantics = [#tpu.dimension_semantics<parallel>], iteration_bounds = array<i64: 2>, scalar_prefetch = 0 : i64, scratch_operands = 1 : i64, tpu.core_type = #tpu.core_type<tc>, window_params = [{transform_indices = @transform_0, window_bounds = array<i64: 1, 4, 256>}, {pipeline_mode = #tpu.pipeline_mode<synchronous>, transform_indices = @transform_1, window_bounds = array<i64: 9, 8, 4>}, {pipeline_mode = #tpu.pipeline_mode<synchronous>, transform_indices = @transform_2, window_bounds = array<i64: 2, 256>}, {transform_indices = @transform_3, window_bounds = array<i64: 1, 8, 2>}]} {
    %c0 = arith.constant 0 : index
    %c0_0 = arith.constant 0 : index
    %c0_1 = arith.constant 0 : index
    %0 = vector.load %arg1[%c0, %c0_0, %c0_1] : memref<1x4x256xf32, #tpu.memory_space<vmem>>, vector<1x4x256xf32>
    %1 = vector.shape_cast %0 : vector<1x4x256xf32> to vector<4x256xf32>
    %cst = arith.constant 0.000000e+00 : f32
    %2 = vector.broadcast %cst : f32 to vector<4x128xf32>
    %c0_2 = arith.constant 0 : index
    %c0_3 = arith.constant 0 : index
    %3 = vector.load %arg5[%c0_2, %c0_3] : memref<4x512xf32, #tpu.memory_space<vmem>>, vector<4x128xf32>
    tpu.vector_store %arg5[%c0_2, %c0_3], %2 {strides = array<i32>} : memref<4x512xf32, #tpu.memory_space<vmem>>, vector<4x128xf32>,
    %c0_4 = arith.constant 0 : index
    %c128 = arith.constant 128 : index
    %4 = vector.load %arg5[%c0_4, %c128] : memref<4x512xf32, #tpu.memory_space<vmem>>, vector<4x256xf32>
    tpu.vector_store %arg5[%c0_4, %c128], %1 {strides = array<i32>} : memref<4x512xf32, #tpu.memory_space<vmem>>, vector<4x256xf32>,
    %cst_5 = arith.constant 0.000000e+00 : f32
    %5 = vector.broadcast %cst_5 : f32 to vector<4x128xf32>
    %c0_6 = arith.constant 0 : index
    %c384 = arith.constant 384 : index
    %6 = vector.load %arg5[%c0_6, %c384] : memref<4x512xf32, #tpu.memory_space<vmem>>, vector<4x128xf32>
    tpu.vector_store %arg5[%c0_6, %c384], %5 {strides = array<i32>} : memref<4x512xf32, #tpu.memory_space<vmem>>, vector<4x128xf32>,
    %c0_7 = arith.constant 0 : index
    %c0_8 = arith.constant 0 : index
    %7 = vector.load %arg5[%c0_7, %c0_8] : memref<4x512xf32, #tpu.memory_space<vmem>>, vector<4x512xf32>
    %c0_9 = arith.constant 0 : index
    %c0_10 = arith.constant 0 : index
    %8 = vector.load %arg3[%c0_9, %c0_10] : memref<2x256xf32, #tpu.memory_space<vmem>>, vector<1x256xf32>
    %c1 = arith.constant 1 : index
    %c0_11 = arith.constant 0 : index
    %9 = vector.load %arg3[%c1, %c0_11] : memref<2x256xf32, #tpu.memory_space<vmem>>, vector<1x256xf32>
    %cst_12 = arith.constant 0.000000e+00 : f32
    %10 = vector.broadcast %cst_12 : f32 to vector<8x256xf32>
    %11 = vector.extract_strided_slice %7 {offsets = [0, 111], sizes = [4, 256], strides = [1, 1]} : vector<4x512xf32> to vector<4x256xf32>
    %12 = vector.broadcast %8 : vector<1x256xf32> to vector<4x256xf32>
    %13 = arith.mulf %11, %12 : vector<4x256xf32>
    %c0_13 = arith.constant 0 : index
    %c0_14 = arith.constant 0 : index
    %c0_15 = arith.constant 0 : index
    %14 = vector.load %arg2[%c0_13, %c0_14, %c0_15] : memref<9x8x4xf32, #tpu.memory_space<vmem>>, vector<1x8x4xf32>
    %15 = vector.shape_cast %14 : vector<1x8x4xf32> to vector<8x4xf32>
    %cst_16 = arith.constant dense<0.000000e+00> : vector<8x256xf32>
    %16 = tpu.matmul %15, %13, %cst_16 {dimension_numbers = #tpu.dot_dimension_numbers<[1], [0], [0], [1], [0, 0, 1, 1], [], []>} : vector<8x4xf32>, vector<4x256xf32>, vector<8x256xf32> -> vector<8x256xf32>
    %17 = arith.addf %10, %16 : vector<8x256xf32>
    %18 = vector.extract_strided_slice %7 {offsets = [0, 112], sizes = [4, 256], strides = [1, 1]} : vector<4x512xf32> to vector<4x256xf32>
    %c1_17 = arith.constant 1 : index
    %c0_18 = arith.constant 0 : index
    %c0_19 = arith.constant 0 : index
    %19 = vector.load %arg2[%c1_17, %c0_18, %c0_19] : memref<9x8x4xf32, #tpu.memory_space<vmem>>, vector<1x8x4xf32>
    %20 = vector.shape_cast %19 : vector<1x8x4xf32> to vector<8x4xf32>
    %cst_20 = arith.constant dense<0.000000e+00> : vector<8x256xf32>
    %21 = tpu.matmul %20, %18, %cst_20 {dimension_numbers = #tpu.dot_dimension_numbers<[1], [0], [0], [1], [0, 0, 1, 1], [], []>} : vector<8x4xf32>, vector<4x256xf32>, vector<8x256xf32> -> vector<8x256xf32>
    %22 = arith.addf %17, %21 : vector<8x256xf32>
    %23 = vector.extract_strided_slice %7 {offsets = [0, 113], sizes = [4, 256], strides = [1, 1]} : vector<4x512xf32> to vector<4x256xf32>
    %24 = vector.broadcast %9 : vector<1x256xf32> to vector<4x256xf32>
    %25 = arith.mulf %23, %24 : vector<4x256xf32>
    %c2 = arith.constant 2 : index
    %c0_21 = arith.constant 0 : index
    %c0_22 = arith.constant 0 : index
    %26 = vector.load %arg2[%c2, %c0_21, %c0_22] : memref<9x8x4xf32, #tpu.memory_space<vmem>>, vector<1x8x4xf32>
    %27 = vector.shape_cast %26 : vector<1x8x4xf32> to vector<8x4xf32>
    %cst_23 = arith.constant dense<0.000000e+00> : vector<8x256xf32>
    %28 = tpu.matmul %27, %25, %cst_23 {dimension_numbers = #tpu.dot_dimension_numbers<[1], [0], [0], [1], [0, 0, 1, 1], [], []>} : vector<8x4xf32>, vector<4x256xf32>, vector<8x256xf32> -> vector<8x256xf32>
    %29 = arith.addf %22, %28 : vector<8x256xf32>
    %30 = vector.extract_strided_slice %7 {offsets = [0, 127], sizes = [4, 256], strides = [1, 1]} : vector<4x512xf32> to vector<4x256xf32>
    %31 = vector.broadcast %8 : vector<1x256xf32> to vector<4x256xf32>
    %32 = arith.mulf %30, %31 : vector<4x256xf32>
    %c3 = arith.constant 3 : index
    %c0_24 = arith.constant 0 : index
    %c0_25 = arith.constant 0 : index
    %33 = vector.load %arg2[%c3, %c0_24, %c0_25] : memref<9x8x4xf32, #tpu.memory_space<vmem>>, vector<1x8x4xf32>
    %34 = vector.shape_cast %33 : vector<1x8x4xf32> to vector<8x4xf32>
    %cst_26 = arith.constant dense<0.000000e+00> : vector<8x256xf32>
    %35 = tpu.matmul %34, %32, %cst_26 {dimension_numbers = #tpu.dot_dimension_numbers<[1], [0], [0], [1], [0, 0, 1, 1], [], []>} : vector<8x4xf32>, vector<4x256xf32>, vector<8x256xf32> -> vector<8x256xf32>
    %36 = arith.addf %29, %35 : vector<8x256xf32>
    %37 = vector.extract_strided_slice %7 {offsets = [0, 128], sizes = [4, 256], strides = [1, 1]} : vector<4x512xf32> to vector<4x256xf32>
    %c4 = arith.constant 4 : index
    %c0_27 = arith.constant 0 : index
    %c0_28 = arith.constant 0 : index
    %38 = vector.load %arg2[%c4, %c0_27, %c0_28] : memref<9x8x4xf32, #tpu.memory_space<vmem>>, vector<1x8x4xf32>
    %39 = vector.shape_cast %38 : vector<1x8x4xf32> to vector<8x4xf32>
    %cst_29 = arith.constant dense<0.000000e+00> : vector<8x256xf32>
    %40 = tpu.matmul %39, %37, %cst_29 {dimension_numbers = #tpu.dot_dimension_numbers<[1], [0], [0], [1], [0, 0, 1, 1], [], []>} : vector<8x4xf32>, vector<4x256xf32>, vector<8x256xf32> -> vector<8x256xf32>
    %41 = arith.addf %36, %40 : vector<8x256xf32>
    %42 = vector.extract_strided_slice %7 {offsets = [0, 129], sizes = [4, 256], strides = [1, 1]} : vector<4x512xf32> to vector<4x256xf32>
    %43 = vector.broadcast %9 : vector<1x256xf32> to vector<4x256xf32>
    %44 = arith.mulf %42, %43 : vector<4x256xf32>
    %c5 = arith.constant 5 : index
    %c0_30 = arith.constant 0 : index
    %c0_31 = arith.constant 0 : index
    %45 = vector.load %arg2[%c5, %c0_30, %c0_31] : memref<9x8x4xf32, #tpu.memory_space<vmem>>, vector<1x8x4xf32>
    %46 = vector.shape_cast %45 : vector<1x8x4xf32> to vector<8x4xf32>
    %cst_32 = arith.constant dense<0.000000e+00> : vector<8x256xf32>
    %47 = tpu.matmul %46, %44, %cst_32 {dimension_numbers = #tpu.dot_dimension_numbers<[1], [0], [0], [1], [0, 0, 1, 1], [], []>} : vector<8x4xf32>, vector<4x256xf32>, vector<8x256xf32> -> vector<8x256xf32>
    %48 = arith.addf %41, %47 : vector<8x256xf32>
    %49 = vector.extract_strided_slice %7 {offsets = [0, 143], sizes = [4, 256], strides = [1, 1]} : vector<4x512xf32> to vector<4x256xf32>
    %50 = vector.broadcast %8 : vector<1x256xf32> to vector<4x256xf32>
    %51 = arith.mulf %49, %50 : vector<4x256xf32>
    %c6 = arith.constant 6 : index
    %c0_33 = arith.constant 0 : index
    %c0_34 = arith.constant 0 : index
    %52 = vector.load %arg2[%c6, %c0_33, %c0_34] : memref<9x8x4xf32, #tpu.memory_space<vmem>>, vector<1x8x4xf32>
    %53 = vector.shape_cast %52 : vector<1x8x4xf32> to vector<8x4xf32>
    %cst_35 = arith.constant dense<0.000000e+00> : vector<8x256xf32>
    %54 = tpu.matmul %53, %51, %cst_35 {dimension_numbers = #tpu.dot_dimension_numbers<[1], [0], [0], [1], [0, 0, 1, 1], [], []>} : vector<8x4xf32>, vector<4x256xf32>, vector<8x256xf32> -> vector<8x256xf32>
    %55 = arith.addf %48, %54 : vector<8x256xf32>
    %56 = vector.extract_strided_slice %7 {offsets = [0, 144], sizes = [4, 256], strides = [1, 1]} : vector<4x512xf32> to vector<4x256xf32>
    %c7 = arith.constant 7 : index
    %c0_36 = arith.constant 0 : index
    %c0_37 = arith.constant 0 : index
    %57 = vector.load %arg2[%c7, %c0_36, %c0_37] : memref<9x8x4xf32, #tpu.memory_space<vmem>>, vector<1x8x4xf32>
    %58 = vector.shape_cast %57 : vector<1x8x4xf32> to vector<8x4xf32>
    %cst_38 = arith.constant dense<0.000000e+00> : vector<8x256xf32>
    %59 = tpu.matmul %58, %56, %cst_38 {dimension_numbers = #tpu.dot_dimension_numbers<[1], [0], [0], [1], [0, 0, 1, 1], [], []>} : vector<8x4xf32>, vector<4x256xf32>, vector<8x256xf32> -> vector<8x256xf32>
    %60 = arith.addf %55, %59 : vector<8x256xf32>
    %61 = vector.extract_strided_slice %7 {offsets = [0, 145], sizes = [4, 256], strides = [1, 1]} : vector<4x512xf32> to vector<4x256xf32>
    %62 = vector.broadcast %9 : vector<1x256xf32> to vector<4x256xf32>
    %63 = arith.mulf %61, %62 : vector<4x256xf32>
    %c8 = arith.constant 8 : index
    %c0_39 = arith.constant 0 : index
    %c0_40 = arith.constant 0 : index
    %64 = vector.load %arg2[%c8, %c0_39, %c0_40] : memref<9x8x4xf32, #tpu.memory_space<vmem>>, vector<1x8x4xf32>
    %65 = vector.shape_cast %64 : vector<1x8x4xf32> to vector<8x4xf32>
    %cst_41 = arith.constant dense<0.000000e+00> : vector<8x256xf32>
    %66 = tpu.matmul %65, %63, %cst_41 {dimension_numbers = #tpu.dot_dimension_numbers<[1], [0], [0], [1], [0, 0, 1, 1], [], []>} : vector<8x4xf32>, vector<4x256xf32>, vector<8x256xf32> -> vector<8x256xf32>
    %67 = arith.addf %60, %66 : vector<8x256xf32>
    %cst_42 = arith.constant dense<0.000000e+00> : vector<8xf32>
    %68 = vector.multi_reduction <add>, %67, %cst_42 [1] : vector<8x256xf32> to vector<8xf32>
    %69 = vector.shape_cast %68 : vector<8xf32> to vector<8x1xf32>
    %cst_43 = arith.constant 3.906250e-03 : f32
    %70 = vector.broadcast %cst_43 : f32 to vector<8x1xf32>
    %71 = arith.mulf %69, %70 : vector<8x1xf32>
    %72 = vector.broadcast %71 : vector<8x1xf32> to vector<8x256xf32>
    %73 = arith.subf %67, %72 : vector<8x256xf32>
    %74 = vector.broadcast %71 : vector<8x1xf32> to vector<8x256xf32>
    %75 = arith.subf %67, %74 : vector<8x256xf32>
    %76 = arith.mulf %73, %75 : vector<8x256xf32>
    %cst_44 = arith.constant dense<0.000000e+00> : vector<8xf32>
    %77 = vector.multi_reduction <add>, %76, %cst_44 [1] : vector<8x256xf32> to vector<8xf32>
    %78 = vector.shape_cast %77 : vector<8xf32> to vector<8x1xf32>
    %79 = tpu.concatenate %69, %78 in 1 : vector<8x1xf32>, vector<8x1xf32> -> vector<8x2xf32>
    %c0_45 = arith.constant 0 : index
    %c0_46 = arith.constant 0 : index
    %c0_47 = arith.constant 0 : index
    %80 = vector.load %arg4[%c0_45, %c0_46, %c0_47] : memref<1x8x2xf32, #tpu.memory_space<vmem>>, vector<1x8x2xf32>
    %81 = vector.shape_cast %80 : vector<1x8x2xf32> to vector<8x2xf32>
    %82 = vector.shape_cast %79 : vector<8x2xf32> to vector<1x8x2xf32>
    tpu.vector_store %arg4[%c0_45, %c0_46, %c0_47], %82 {strides = array<i32>} : memref<1x8x2xf32, #tpu.memory_space<vmem>>, vector<1x8x2xf32>,
    return
  }
  func.func @transform_0(%arg0: i32) -> (i32, i32, i32) {
    %c0_i32 = arith.constant 0 : i32
    %c0_i32_0 = arith.constant 0 : i32
    %c0_i32_1 = arith.constant 0 : i32
    return %arg0, %c0_i32, %c0_i32_0 : i32, i32, i32
  }
  func.func @transform_1(%arg0: i32) -> (i32, i32, i32) {
    %c0_i32 = arith.constant 0 : i32
    %c0_i32_0 = arith.constant 0 : i32
    %c0_i32_1 = arith.constant 0 : i32
    %c0_i32_2 = arith.constant 0 : i32
    return %c0_i32, %c0_i32_0, %c0_i32_1 : i32, i32, i32
  }
  func.func @transform_2(%arg0: i32) -> (i32, i32) {
    %c0_i32 = arith.constant 0 : i32
    %c0_i32_0 = arith.constant 0 : i32
    %c0_i32_1 = arith.constant 0 : i32
    return %c0_i32, %c0_i32_0 : i32, i32
  }
  func.func @transform_3(%arg0: i32) -> (i32, i32, i32) {
    %c0_i32 = arith.constant 0 : i32
    %c0_i32_0 = arith.constant 0 : i32
    %c0_i32_1 = arith.constant 0 : i32
    return %arg0, %c0_i32, %c0_i32_0 : i32, i32, i32
  }
}

</mosaic_0001>

<bundles_post_ra>
// kernel: tpu_custom_call.1
= control target key start
LH: loop header
LB: loop body
LE: loop exit
PB: predicated region body
PF: predicated region fallthrough
CT: control target
= control target key end

     0   :  { %s1242_s12 = smov 0   ;;  %s1399_s0 = inlined_call_operand.vmem [shape: f32[2,4,256], index: 0, kind: input, shape index: {}]   ;;  %s1400_s1 = inlined_call_operand.vmem [shape: f32[9,8,4], index: 1, kind: input, shape index: {}]   ;;  %s1401_s2 = inlined_call_operand.vmem [shape: f32[2,256], index: 2, kind: input, shape index: {}]   ;;  %s1402_s3 = inlined_call_operand.vmem [shape: f32[2,8,2], index: 3, kind: output, shape index: {}]  }
   0x1 LB: > { %s1123_s13 = sadd.s32 4294967295, %s1211_s12   ;;  %p1127_p0 = scmp.ge.s32.totalorder %s1211_s12, 1  ;;  %s1211_s12 = sphi %s1242_s12, %s13_s12  }
   0x2   : > { %p137_p1 = scmp.lt.s32.totalorder %s1211_s12, 3 }
   0x4   : > { %p138_p2 = pnand %p1127_p0, %p137_p1 }
   0x5   : > { %v179_v0 = vlaneseq (!%p138_p2)  ;;  %p160_p3 = scmp.lt.s32.totalorder (!%p138_p2), %s1123_s13, 1  ;;  %v1213_v1 = vmov (!%p138_p2), 0.0   ;;  %v175_v2 = vld [vmem:[%s1401_s2] ss:$2 sm:$0x3] (!%p138_p2)  ;;  %s1214_s22 = smov (!%p138_p2), 111  }
   0x6   : > { %141 = sbr.rel (%p138_p2) target bundleno = 794 (0x31a), region = 32  ;;  %170 = vst [vmem:[#allocation2] sm:$0xf] (!%p138_p2), %v1213_v1  ;;  %172 = vst [vmem:[#allocation2 + $0xc] sm:$0xf] (!%p138_p2), %v1213_v1  ;;  %671 = vmatprep.mubr.f32.mxu0 (!%p138_p2), %v1213_v1  ;;  %285 = vmatprep.mubr.f32.mxu1 (!%p138_p2), %v1213_v1  ;;  %s1215_s23 = smov (!%p138_p2), 127  }
   0x7   : > { %v180_v3 = vshrl.u32 (!%p138_p2), %v179_v0, 7  ;;  %v1131_v4 = vld [vmem:[%s1401_s2 + $0x1] ss:$2 sm:$0x3] (!%p138_p2)  ;;  %s1216_s24 = smov (!%p138_p2), 113   ;;  %s1217_s25 = smov (!%p138_p2), 16  }
   0x8   : > { %vm216_vm0 = vcmask (!%p138_p2), 1043456   ;;  %vm212_vm1 = vcmask (!%p138_p2), 31744   ;;  %v1147_v17 = vld [vmem:[%s1400_s1 + $0x20] sm:$0xff] (!%p138_p2)  ;;  %s1218_s28 = smov (!%p138_p2), 112   ;;  %vm395_vm2 = vcmask (!%p138_p2), 924672   ;;  %vm191_vm3 = vcmask (!%p138_p2), 908288  }
   0x9   : > { %v181_v5 = vsub.s32 (!%p138_p2), 0, %v180_v3  ;;  %v185_v6 = vsub.s32 (!%p138_p2), 1, %v180_v3  ;;  %s1219_s29 = smov (!%p138_p2), 17   ;;  %vm498_vm4 = vcmask (!%p138_p2), 1039360   ;;  %s1220_s30 = smov (!%p138_p2), 15   ;;  %vm209_vm5 = vcmask (!%p138_p2), 130048  }
   0xa   : > { %v1151_v47 = vld [vmem:[%s1400_s1 + $0x28] sm:$0xff] (!%p138_p2)  ;;  %s1221_s8 = smov (!%p138_p2), 1   ;;  %v1155_v59 = vld [vmem:[%s1400_s1 + $0x30] sm:$0xff] (!%p138_p2)  ;;  %vm301_vm6 = vcmask (!%p138_p2), 138240   ;;  %vm412_vm7 = vcmask (!%p138_p2), 121856   ;;  %vm879_vm8 = vcmask (!%p138_p2), 916480  }
   0xb   : > { %v182_v7 = vrot.slane (!%p138_p2), %v175_v2, %v181_v5  ;;  %v186_v8 = vrot.slane (!%p138_p2), %v175_v2, %v185_v6  ;;  %v386_v9 = vrot.slane (!%p138_p2), %v1131_v4, %v181_v5  ;;  %v390_v10 = vrot.slane (!%p138_p2), %v1131_v4, %v185_v6  ;;  %v1132_v55 = vld [vmem:[%s1400_s1 + $0x8] sm:$0xff] (!%p138_p2) }
   0xc   : > { %vm515_vm9 = vcmask (!%p138_p2), 7168   ;;  %vm1068_vm10 = vcmask (!%p138_p2), 15360  }
   0xd   : > { %s1404_s13 = smov (!%p160_p3, %s1123_s13), 1  ;;  %v1268_v12 = vcombine.low %v182_v7, %v186_v8  ;;  %v1272_v13 = vcombine.low %v386_v9, %v390_v10  ;;  %v197_v7 = vld [vmem:[%s1400_s1] sm:$0xff] }
   0xe   : > { %s1169_s18 = sshll.u32 %s1404_s13, 3 }
   0xf   : > { %s164_s21 = scalar_lea.vmem %s1399_s0, %s1169_s18  ;;  %188 = vrot.lane.b32.xlu0 %v1268_v12, %s1214_s22  ;;  %495 = vrot.lane.b32.xlu1 %v1268_v12, %s1215_s23  ;;  %s168_s26 = scalar_lea.vmem %s1402_s3, %s1169_s18 }
  0x10   : > { %v169_v11 = vld [vmem:[%s164_s21] sm:$0xff] }
  0x11   : > { %171 = vst [vmem:[#allocation2 + $0x4] sm:$0xff] %v169_v11 }
  0x13   : > { %392 = vrot.lane.b32.xlu0 %v1272_v13, %s1216_s24 }
  0x18   : > { %v1276_v14 = vld [vmem:[#allocation2] sm:$0xff]  ;;  %v1278_v15 = vld [vmem:[#allocation2 + $0x8] sm:$0xff] }
  0x19   : > { %680 = vrot.lane.b32.xlu1 %v1276_v14, %s1215_s23  ;;  %682 = vrot.lane.b32.xlu0 %v1278_v15, %s1215_s23  ;;  %v1287_v16 = vcombine.high %v1276_v14, %v1276_v14  ;;  %v872_v48 = vcombine.high %v1278_v15, %v1278_v15 }
  0x1a   : > { %1148 = vmatprep.subr.msk.mxu0 %vm216_vm0, %v1278_v15 }
  0x1b   : > { %1149 = vmatpush1.msk.msra.mxu0 %vm216_vm0, %v1287_v16 }
  0x1c   : > { %1150 = vmatmul.mubr.msk.f32.vlgmr.msra.gmra.mrb[0].mxu0 %vm212_vm1, %v1147_v17 }
  0x1d   : > { %203 = vrot.lane.b32.xlu1 %v1276_v14, %s1217_s25  ;;  %207 = vrot.lane.b32.xlu0 %v1278_v15, %s1217_s25 }
  0x1e   : > { %766 = vmatprep.mubr.f32.mxu0 %v1213_v1 }
  0x21   : > { %777 = vrot.lane.b32.xlu1 %v1278_v15, %s1216_s24  ;;  %775 = vrot.lane.b32.xlu0 %v1276_v14, %s1216_s24 }
  0x25   : > { %205 = vrot.lane.b32.xlu1 %v1287_v16, %s1217_s25 }
  0x29   : > { %875 = vrot.lane.b32.xlu1 %v1278_v15, %s1218_s28 }
  0x81   : > { %v189_v18 = vpop.permute.xlu0 %188  ;;  %v1302_v20 = vpop.permute.xlu1 %495 }
  0x82   : > { %v190_v19 = vrot.slane %v189_v18, 4  ;;  %v497_v27 = vrot.slane %v1302_v20, 4 }
  0x84   : > { %v196_v21 = vmul.f32 %v190_v19, %v1278_v15  ;;  %v192_v29 = vsel %vm191_vm3, %v190_v19, %v189_v18  ;;  %v499_v35 = vsel %vm498_vm4, %v497_v27, %v1302_v20  ;;  %v503_v60 = vmul.f32 %v497_v27, %v1278_v15  ;;  %v1139_v18 = vld [vmem:[%s1400_s1 + $0x10] sm:$0xff] }
  0x85   : > { %v393_v22 = vpop.permute.xlu0 %392  ;;  %v195_v34 = vmul.f32 %v192_v29, %v1276_v14  ;;  %v502_v41 = vmul.f32 %v499_v35, %v1276_v14 }
  0x86   : > { %v394_v23 = vrot.slane %v393_v22, 4  ;;  %299 = vrot.lane.b32.xlu1 %v196_v21, %s1219_s29 }
  0x87   : > { %v294_v43 = vcombine.high %v195_v34, %v195_v34  ;;  %v508_v50 = vcombine.high %v502_v41, %v502_v41 }
  0x88   : > { %v396_v25 = vsel %vm395_vm2, %v394_v23, %v393_v22  ;;  %v400_v26 = vmul.f32 %v394_v23, %v1278_v15 }
  0x89   : > { %v399_v30 = vmul.f32 %v396_v25, %v1276_v14 }
  0x8a   : > { %410 = vrot.lane.b32.xlu0 %v400_v26, %s1220_s30 }
  0x8b   : > { %v681_v24 = vpop.permute.xlu1 %680  ;;  %v683_v31 = vpop.permute.xlu0 %682  ;;  %406 = vrot.lane.b32.xlu1 %v399_v30, %s1220_s30  ;;  %v405_v37 = vcombine.high %v399_v30, %v399_v30  ;;  %v1163_v30 = vld [vmem:[%s1400_s1 + $0x40] sm:$0xff] }
  0x8c   : > { %v684_v28 = vrot.slane %v681_v24, 4  ;;  %v685_v32 = vrot.slane %v683_v31, 4 }
  0x8e   : > { %v686_v36 = vsel %vm216_vm0, %v684_v28, %v685_v32  ;;  %295 = vrot.lane.b32.xlu0 %v195_v34, %s1219_s29  ;;  %v1143_v28 = vld [vmem:[%s1400_s1 + $0x18] sm:$0xff] }
  0x8f   : > { %v204_v33 = vpop.permute.xlu1 %203  ;;  %v687_v38 = vsel %vm498_vm4, %v686_v36, %v683_v31  ;;  %v208_v39 = vpop.permute.xlu0 %207  ;;  %408 = vrot.lane.b32.xlu1 %v405_v37, %s1220_s30 }
  0x90   : > { %v690_v40 = vmul.f32 %v687_v38, %v1272_v13 }
  0x92   : > { %v694_v44 = vcombine.high %v690_v40, %v690_v40  ;;  %297 = vrot.lane.b32.xlu0 %v294_v43, %s1219_s29 }
  0x93   : > { %v778_v42 = vpop.permute.xlu1 %777  ;;  %v776_v46 = vpop.permute.xlu0 %775  ;;  %962 = vrot.lane.b32.xlu1 %v1276_v14, %s1214_s22 }
  0x94   : > { %v780_v45 = vrot.slane %v778_v42, 4  ;;  %v779_v49 = vrot.slane %v776_v46, 4  ;;  %1152 = vmatprep.subr.msk.mxu0 %vm216_vm0, %v694_v44 }
  0x95   : > { %1153 = vmatpush1.msk.msra.mxu0 %vm216_vm0, %v690_v40 }
  0x96   : > { %v781_v52 = vsel %vm216_vm0, %v779_v49, %v780_v45  ;;  %1154 = vmatmul.mubr.msk.f32.vlgmr.msra.gmra.mrb[0].mxu0 %vm212_vm1, %v1151_v47  ;;  %877 = vrot.lane.b32.xlu0 %v872_v48, %s1218_s28 }
  0x97   : > { %v206_v51 = vpop.permute.xlu1 %205  ;;  %v782_v56 = vsel %vm395_vm2, %v781_v52, %v778_v42  ;;  %861 = vmatprep.mubr.f32.mxu0 %v1213_v1  ;;  %511 = vrot.lane.b32.xlu1 %v508_v50, %s1221_s8 }
  0x98   : > { %v211_v53 = vsel %vm209_vm5, %v206_v51, %v208_v39  ;;  %v210_v54 = vsel %vm209_vm5, %v204_v33, %v206_v51  ;;  %v785_v57 = vmul.f32 %v782_v56, %v1268_v12 }
  0x99   : > { %1133 = vmatprep.subr.msk.mxu1 %vm216_vm0, %v211_v53 }
  0x9a   : > { %1134 = vmatpush1.msk.msra.mxu1 %vm216_vm0, %v210_v54  ;;  %v789_v58 = vcombine.high %v785_v57, %v785_v57  ;;  %873 = vrot.lane.b32.xlu0 %v1287_v16, %s1218_s28 }
  0x9b   : > { %1135 = vmatmul.mubr.msk.f32.vlgmr.msra.gmra.mrb[0].mxu1 %vm212_vm1, %v1132_v55  ;;  %509 = vrot.lane.b32.xlu1 %v502_v41, %s1221_s8  ;;  %v876_v61 = vpop.permute.xlu1 %875 }
  0x9c   : > { %375 = vmatprep.mubr.f32.mxu1 %v1213_v1  ;;  %1156 = vmatprep.subr.msk.mxu0 %vm216_vm0, %v789_v58 }
  0x9d   : > { %1157 = vmatpush1.msk.msra.mxu0 %vm216_vm0, %v785_v57 }
  0x9e   : > { %1158 = vmatmul.mubr.msk.f32.vlgmr.msra.gmra.mrb[0].mxu0 %vm212_vm1, %v1155_v59  ;;  %964 = vrot.lane.b32.xlu0 %v1278_v15, %s1214_s22  ;;  %v1159_v15 = vld [vmem:[%s1400_s1 + $0x38] sm:$0xff] }
  0x9f   : > { %953 = vmatprep.mubr.f32.mxu0 %v1213_v1 }
  0xa2   : > { %513 = vrot.lane.b32.xlu0 %v503_v60, %s1221_s8 }
  0xf8   : > { %v300_v62 = vpop.permute.xlu1 %299 }
  0xfc   : > { %v411_v63 = vpop.permute.xlu0 %410 }
  0xfd   : > { %v407_v0 = vpop.permute.xlu1 %406 }
 0x100   : > { %v296_v2 = vpop.permute.xlu0 %295 }
 0x101   : > { %v409_v3 = vpop.permute.xlu1 %408 }
 0x102   : > { %v414_v8 = vsel %vm412_vm7, %v409_v3, %v411_v63  ;;  %v413_v10 = vsel %vm412_vm7, %v407_v0, %v409_v3 }
 0x104   : > { %v298_v4 = vpop.permute.xlu0 %297 }
 0x105   : > { %v302_v5 = vsel %vm301_vm6, %v296_v2, %v298_v4  ;;  %v303_v6 = vsel %vm301_vm6, %v298_v4, %v300_v62  ;;  %v963_v9 = vpop.permute.xlu1 %962 }
 0x106   : > { %1136 = vmatprep.subr.msk.mxu1 %vm216_vm0, %v303_v6  ;;  %v966_v19 = vrot.slane %v963_v9, 4 }
 0x107   : > { %1137 = vmatpush1.msk.msra.mxu1 %vm216_vm0, %v302_v5 }
 0x108   : > { %1138 = vmatmul.mubr.msk.f32.vlgmr.msra.gmra.mrb[0].mxu1 %vm212_vm1, %v197_v7  ;;  %1140 = vmatprep.subr.msk.mxu1 %vm216_vm0, %v414_v8  ;;  %v878_v11 = vpop.permute.xlu0 %877 }
 0x109   : > { %v881_v12 = vsel %vm879_vm8, %v876_v61, %v878_v11  ;;  %1141 = vmatpush1.msk.msra.mxu1 %vm216_vm0, %v413_v10  ;;  %486 = vmatprep.mubr.f32.mxu1 %v1213_v1  ;;  %v512_v16 = vpop.permute.xlu1 %511 }
 0x10a   : > { %1160 = vmatprep.subr.msk.mxu0 %vm216_vm0, %v881_v12 }
 0x10c   : > { %v874_v14 = vpop.permute.xlu0 %873 }
 0x10d   : > { %v880_v17 = vsel %vm879_vm8, %v874_v14, %v876_v61  ;;  %v510_v22 = vpop.permute.xlu1 %509 }
 0x10e   : > { %1161 = vmatpush1.msk.msra.mxu0 %vm216_vm0, %v880_v17  ;;  %v516_v29 = vsel %vm515_vm9, %v510_v22, %v512_v16 }
 0x10f   : > { %1162 = vmatmul.mubr.msk.f32.vlgmr.msra.gmra.mrb[0].mxu0 %vm212_vm1, %v1159_v15 }
 0x110   : > { %1142 = vmatmul.mubr.msk.f32.vlgmr.msra.gmra.mrb[0].mxu1 %vm212_vm1, %v1139_v18  ;;  %v965_v20 = vpop.permute.xlu0 %964  ;;  %1047 = vmatprep.mubr.f32.mxu0 %v1213_v1 }
 0x111   : > { %v967_v21 = vrot.slane %v965_v20, 4  ;;  %589 = vmatprep.mubr.f32.mxu1 %v1213_v1 }
 0x113   : > { %v968_v23 = vsel %vm216_vm0, %v966_v19, %v967_v21 }
 0x114   : > { %v969_v24 = vsel %vm191_vm3, %v968_v23, %v965_v20  ;;  %v514_v25 = vpop.permute.xlu0 %513 }
 0x115   : > { %v971_v26 = vmul.f32 %v969_v24, %v1272_v13  ;;  %v517_v27 = vsel %vm515_vm9, %v512_v16, %v514_v25 }
 0x116   : > { %1144 = vmatprep.subr.msk.mxu1 %vm216_vm0, %v517_v27 }
 0x117   : > { %v975_v1 = vcombine.high %v971_v26, %v971_v26  ;;  %1145 = vmatpush1.msk.msra.mxu1 %vm216_vm0, %v516_v29 }
 0x118   : > { %1146 = vmatmul.mubr.msk.f32.vlgmr.msra.gmra.mrb[0].mxu1 %vm212_vm1, %v1143_v28 }
 0x119   : > { %1164 = vmatprep.subr.msk.mxu0 %vm216_vm0, %v975_v1 }
 0x11a   : > { %1165 = vmatpush1.msk.msra.mxu0 %vm216_vm0, %v971_v26 }
 0x11b   : > { %1166 = vmatmul.mubr.msk.f32.vlgmr.msra.gmra.mrb[0].mxu0 %vm212_vm1, %v1163_v30 }
 0x1eb   : > { %v591_v13 = vpop.f32.mrb[0].mxu1 }
 0x1ec   : > { %v593_v31 = vpop.f32.mrb[1].mxu1 }
 0x1ee   : > { %v1049_v32 = vpop.f32.mrb[0].mxu0 }
 0x1ef   : > { %v1170_v33 = vadd.f32 %v1049_v32, %v591_v13  ;;  %v1051_v34 = vpop.f32.mrb[1].mxu0 }
 0x1f0   : > { %v1171_v35 = vadd.f32 %v1051_v34, %v593_v31 }
 0x1f2   : > { %v1056_v36 = vadd.f32 %v1171_v35, %v1170_v33 }
 0x1f4   : > { %1057 = vadd.xlane.f32.xlu0 %v1056_v36 }
 0x281   : > { %v1058_v37 = vpop.xlane.xlu0 %1057 }
 0x282   : > { %v1059_v38 = vmul.f32 0.00390625, %v1058_v37 }
 0x284   : > { %v1060_v39 = vsub.f32 %v1170_v33, %v1059_v38  ;;  %v1061_v40 = vsub.f32 %v1171_v35, %v1059_v38 }
 0x286   : > { %v1062_v41 = vmul.f32 %v1060_v39, %v1060_v39  ;;  %v1063_v42 = vmul.f32 %v1061_v40, %v1061_v40 }
 0x288   : > { %v1064_v43 = vadd.f32 %v1063_v42, %v1062_v41 }
 0x28a   : > { %1065 = vadd.xlane.f32.xlu1 %v1064_v43 }
 0x317   : > { %v1066_v44 = vpop.xlane.xlu1 %1065 }
 0x318   : > { %v1067_v45 = vsel %vm515_vm9, %v1058_v37, %v1066_v44 }
 0x319   : > { %1069 = vst.msk [vmem:[%s168_s26] sm:$0xff] %vm1068_vm10, %v1067_v45 }
 0x31a PF: > { %s13_s12 = sadd.s32 1, %s1211_s12  }
 0x31b   : > { %p10_p4 = scmp.ge.s32.totalorder %s13_s12, 4  }
 0x31d   :  { %12 = sbr.rel (!%p10_p4) target bundleno = 1 (0x1), region = 71 }

</bundles_post_ra>
